<compile_context>
chip_gen: v7x
topology: tpu7x:2x2x1
jax: 0.10.0
libtpu: 0.0.40
codegen_flags: <defaults>
</compile_context>

<pallas_src>
import jax
import jax.numpy as jnp
from jax.experimental import pallas as pl
from jax.experimental.pallas import tpu as pltpu


def _round_up(a: int, b: int) -> int:
    return ((a + b - 1) // b) * b


def prenet_kernel(x_ref, w1_ref, b1_ref, w2_ref, b2_ref, o_ref):
    # x_ref: [TM, D_in] (compute dtype), w1: [D_in, H], b1: [1, H] (f32),
    # w2: [H, D_out_pad], b2: [1, D_out_pad] (f32), o_ref: [TM, D_out_pad].
    x = x_ref[...]
    h = jnp.dot(x, w1_ref[...], preferred_element_type=jnp.float32) + b1_ref[...]
    h = jnp.maximum(h, 0.0)            # ReLU in f32 (dropout = identity, eval)
    h = h.astype(w2_ref.dtype)         # downcast only for the second MXU pass
    y = jnp.dot(h, w2_ref[...], preferred_element_type=jnp.float32) + b2_ref[...]
    y = jnp.maximum(y, 0.0)            # ReLU in f32 (dropout = identity, eval)
    o_ref[...] = y.astype(o_ref.dtype)


def prenet_forward(x, w1, b1, w2, b2, *, block_rows=1024,
                   compute_dtype=jnp.bfloat16, out_dtype=None):
    """x: [B, T, D_in]. Returns [B, T, D_out].

    block_rows: max row-tile size over N = B*T (the single grid axis).
    compute_dtype: dtype for x / w1 / w2 fed to the MXU (default bf16);
      biases and accumulation stay f32. Pass jnp.float32 for exact f32.
    out_dtype: output dtype (default: x.dtype). Pass jnp.bfloat16 to halve the
      output HBM stream when the consumer accepts it.
    """
    B, T, D_in = x.shape
    H = w1.shape[1]
    D_out = w2.shape[1]
    N = B * T
    out_dtype = x.dtype if out_dtype is None else out_dtype

    x2d = x.reshape(N, D_in)
    if compute_dtype is not None:
        x2d = x2d.astype(compute_dtype)
        w1 = w1.astype(compute_dtype)
        w2 = w2.astype(compute_dtype)

    # Lane-dense output feature dim only when padding is actually required;
    # skip both the pad and the post-kernel slice when D_out % 128 == 0.
    D_out_pad = _round_up(D_out, 128)
    if D_out_pad != D_out:
        w2 = jnp.pad(w2, ((0, 0), (0, D_out_pad - D_out)))
        b2 = jnp.pad(b2, ((0, 0), (0, D_out_pad - D_out)))

    # Row tile: sublane granule (bf16 packs 16 rows per vreg, f32 packs 8).
    granule = 16 if jnp.dtype(x2d.dtype).itemsize == 2 else 8
    TM = min(_round_up(block_rows, granule), _round_up(N, granule))
    # v7x has 2 TensorCores: if one tile would cover all rows but there is
    # enough work, split into >= 2 parallel row tiles so both cores run.
    if TM >= N and N >= 256:
        TM = _round_up(pl.cdiv(N, 2), granule)
    TM = max(TM, granule)
    grid = (pl.cdiv(N, TM),)  # ragged tail block handled by Pallas masking

    # Right-sized scoped-VMEM limit from the actual working set (+ slack):
    # double-buffered x/out tiles, resident weights/biases, f32 intermediates.
    xb = jnp.dtype(x2d.dtype).itemsize
    wb = jnp.dtype(w1.dtype).itemsize
    ob = jnp.dtype(out_dtype).itemsize
    working = (2 * TM * (D_in * xb + D_out_pad * ob)
               + 2 * (D_in * H + H * D_out_pad) * wb
               + 2 * (H + D_out_pad) * 4
               + TM * (H + D_out_pad) * 4)
    vmem_limit = int(min(max(2 * working + (2 << 20), 16 << 20), 64 << 20))

    out = pl.pallas_call(
        prenet_kernel,
        out_shape=jax.ShapeDtypeStruct((N, D_out_pad), out_dtype),
        grid_spec=pltpu.PrefetchScalarGridSpec(
            num_scalar_prefetch=0,
            grid=grid,
            in_specs=[
                # x: row-tiled, auto double-buffered across grid steps.
                pl.BlockSpec((TM, D_in), lambda i: (i, 0)),
                # Weights / biases: constant block index -> fetched once,
                # VMEM-resident for the whole grid.
                pl.BlockSpec((D_in, H), lambda i: (0, 0)),
                pl.BlockSpec((1, H), lambda i: (0, 0)),
                pl.BlockSpec((H, D_out_pad), lambda i: (0, 0)),
                pl.BlockSpec((1, D_out_pad), lambda i: (0, 0)),
            ],
            out_specs=pl.BlockSpec((TM, D_out_pad), lambda i: (i, 0)),
        ),
        compiler_params=pltpu.CompilerParams(
            # Row tiles are fully independent -> shardable across TCs (v7x).
            dimension_semantics=("parallel",),
            vmem_limit_bytes=vmem_limit,
        ),
    )(x2d, w1, b1, w2, b2)

    if D_out_pad != D_out:
        out = out[:, :D_out]
    return out.reshape(B, T, D_out)


def init_prenet_params(key, input_size, hidden_size, output_size):
    """Deterministic synthetic params mirroring nn.Linear shapes.

    PyTorch stores Linear weight as (out, in) and computes x @ W.T + b; we
    store the transposed (in, out) matrices directly for the kernel.
    """
    k1, k2, k3, k4 = jax.random.split(key, 4)
    s1 = 1.0 / jnp.sqrt(input_size)
    s2 = 1.0 / jnp.sqrt(hidden_size)
    w1 = jax.random.uniform(k1, (input_size, hidden_size), jnp.float32, -s1, s1)
    b1 = jax.random.uniform(k2, (1, hidden_size), jnp.float32, -s1, s1)
    w2 = jax.random.uniform(k3, (hidden_size, output_size), jnp.float32, -s2, s2)
    b2 = jax.random.uniform(k4, (1, output_size), jnp.float32, -s2, s2)
    return w1, b1, w2, b2


def _ref_forward(x, w1, b1, w2, b2, compute_dtype=None):
    """Pure-JAX reference mirroring the kernel's casting behaviour."""
    B, T, D_in = x.shape
    hp = jax.lax.Precision.HIGHEST

    def cast(a):
        if compute_dtype is None:
            return a
        return a.astype(compute_dtype).astype(jnp.float32)

    h = jnp.dot(cast(x.reshape(-1, D_in)), cast(w1), precision=hp) + b1
    h = jnp.maximum(h, 0.0)
    y = jnp.dot(cast(h), cast(w2), precision=hp) + b2
    y = jnp.maximum(y, 0.0)
    return y.reshape(B, T, w2.shape[1]).astype(x.dtype)


if __name__ == "__main__":
    key = jax.random.PRNGKey(0)
    k_x, k_p, k_x2, k_p2 = jax.random.split(key, 4)

    # Test 1: exact f32 path, small shapes, single tile, padded D_out 32->128.
    B, T = 2, 8
    input_size, hidden_size, output_size = 32, 32, 32
    x = jax.random.normal(k_x, (B, T, input_size), jnp.float32)
    w1, b1, w2, b2 = init_prenet_params(k_p, input_size, hidden_size, output_size)

    y = prenet_forward(x, w1, b1, w2, b2, compute_dtype=jnp.float32)
    y = jax.block_until_ready(y)
    y_ref = _ref_forward(x, w1, b1, w2, b2)
    assert y.shape == (B, T, output_size)
    assert jnp.allclose(y, y_ref, atol=1e-4, rtol=1e-4)

    # Test 2: default bf16 path, multi-step row tiling with a ragged tail
    # (N = 1200, TM = 1024 -> grid = 2), D_out % 128 == 0 (no pad, no slice).
    B2, T2 = 2, 600
    d_in2, h2, d_out2 = 80, 256, 256
    x2 = jax.random.normal(k_x2, (B2, T2, d_in2), jnp.float32)
    p2 = init_prenet_params(k_p2, d_in2, h2, d_out2)

    y2 = prenet_forward(x2, *p2)  # bf16 compute, f32 accumulation
    y2 = jax.block_until_ready(y2)
    y2_ref = _ref_forward(x2, *p2, compute_dtype=jnp.bfloat16)
    assert y2.shape == (B2, T2, d_out2)
    assert jnp.allclose(y2, y2_ref, atol=1e-2, rtol=1e-2)

    print("KERNEL_OK")
</pallas_src>

<mosaic_0001>
module attributes {stable_mosaic.version = 11 : i64} {
  func.func @prenet_kernel(%arg0: i32, %arg1: memref<16x32xf32, #tpu.memory_space<vmem>>, %arg2: memref<32x32xf32, #tpu.memory_space<vmem>>, %arg3: memref<1x32xf32, #tpu.memory_space<vmem>>, %arg4: memref<32x128xf32, #tpu.memory_space<vmem>>, %arg5: memref<1x128xf32, #tpu.memory_space<vmem>>, %arg6: memref<16x128xf32, #tpu.memory_space<vmem>>) attributes {dimension_semantics = [#tpu.dimension_semantics<parallel>], iteration_bounds = array<i64: 1>, scalar_prefetch = 0 : i64, scratch_operands = 0 : i64, tpu.core_type = #tpu.core_type<tc>, window_params = [{transform_indices = @transform_0, window_bounds = array<i64: 16, 32>}, {pipeline_mode = #tpu.pipeline_mode<synchronous>, transform_indices = @transform_1, window_bounds = array<i64: 32, 32>}, {pipeline_mode = #tpu.pipeline_mode<synchronous>, transform_indices = @transform_2, window_bounds = array<i64: 1, 32>}, {pipeline_mode = #tpu.pipeline_mode<synchronous>, transform_indices = @transform_3, window_bounds = array<i64: 32, 128>}, {pipeline_mode = #tpu.pipeline_mode<synchronous>, transform_indices = @transform_4, window_bounds = array<i64: 1, 128>}, {transform_indices = @transform_5, window_bounds = array<i64: 16, 128>}]} {
    %c0 = arith.constant 0 : index
    %c0_0 = arith.constant 0 : index
    %0 = vector.load %arg1[%c0, %c0_0] : memref<16x32xf32, #tpu.memory_space<vmem>>, vector<16x32xf32>
    %c0_1 = arith.constant 0 : index
    %c0_2 = arith.constant 0 : index
    %1 = vector.load %arg2[%c0_1, %c0_2] : memref<32x32xf32, #tpu.memory_space<vmem>>, vector<32x32xf32>
    %cst = arith.constant dense<0.000000e+00> : vector<16x32xf32>
    %2 = tpu.matmul %0, %1, %cst {dimension_numbers = #tpu.dot_dimension_numbers<[1], [0], [0], [1], [0, 0, 1, 1], [], []>} : vector<16x32xf32>, vector<32x32xf32>, vector<16x32xf32> -> vector<16x32xf32>
    %c0_3 = arith.constant 0 : index
    %c0_4 = arith.constant 0 : index
    %3 = vector.load %arg3[%c0_3, %c0_4] : memref<1x32xf32, #tpu.memory_space<vmem>>, vector<1x32xf32>
    %4 = vector.broadcast %3 : vector<1x32xf32> to vector<16x32xf32>
    %5 = arith.addf %2, %4 : vector<16x32xf32>
    %cst_5 = arith.constant 0.000000e+00 : f32
    %6 = vector.broadcast %cst_5 : f32 to vector<16x32xf32>
    %7 = arith.maximumf %5, %6 : vector<16x32xf32>
    %c0_6 = arith.constant 0 : index
    %c0_7 = arith.constant 0 : index
    %8 = vector.load %arg4[%c0_6, %c0_7] : memref<32x128xf32, #tpu.memory_space<vmem>>, vector<32x128xf32>
    %cst_8 = arith.constant dense<0.000000e+00> : vector<16x128xf32>
    %9 = tpu.matmul %7, %8, %cst_8 {dimension_numbers = #tpu.dot_dimension_numbers<[1], [0], [0], [1], [0, 0, 1, 1], [], []>} : vector<16x32xf32>, vector<32x128xf32>, vector<16x128xf32> -> vector<16x128xf32>
    %c0_9 = arith.constant 0 : index
    %c0_10 = arith.constant 0 : index
    %10 = vector.load %arg5[%c0_9, %c0_10] : memref<1x128xf32, #tpu.memory_space<vmem>>, vector<1x128xf32>
    %11 = vector.broadcast %10 : vector<1x128xf32> to vector<16x128xf32>
    %12 = arith.addf %9, %11 : vector<16x128xf32>
    %cst_11 = arith.constant 0.000000e+00 : f32
    %13 = vector.broadcast %cst_11 : f32 to vector<16x128xf32>
    %14 = arith.maximumf %12, %13 : vector<16x128xf32>
    %c0_12 = arith.constant 0 : index
    %c0_13 = arith.constant 0 : index
    %15 = vector.load %arg6[%c0_12, %c0_13] : memref<16x128xf32, #tpu.memory_space<vmem>>, vector<16x128xf32>
    tpu.vector_store %arg6[%c0_12, %c0_13], %14 {strides = array<i32>} : memref<16x128xf32, #tpu.memory_space<vmem>>, vector<16x128xf32>,
    return
  }
  func.func @transform_0(%arg0: i32) -> (i32, i32) {
    %c0_i32 = arith.constant 0 : i32
    %c0_i32_0 = arith.constant 0 : i32
    return %arg0, %c0_i32 : i32, i32
  }
  func.func @transform_1(%arg0: i32) -> (i32, i32) {
    %c0_i32 = arith.constant 0 : i32
    %c0_i32_0 = arith.constant 0 : i32
    %c0_i32_1 = arith.constant 0 : i32
    return %c0_i32, %c0_i32_0 : i32, i32
  }
  func.func @transform_2(%arg0: i32) -> (i32, i32) {
    %c0_i32 = arith.constant 0 : i32
    %c0_i32_0 = arith.constant 0 : i32
    %c0_i32_1 = arith.constant 0 : i32
    return %c0_i32, %c0_i32_0 : i32, i32
  }
  func.func @transform_3(%arg0: i32) -> (i32, i32) {
    %c0_i32 = arith.constant 0 : i32
    %c0_i32_0 = arith.constant 0 : i32
    %c0_i32_1 = arith.constant 0 : i32
    return %c0_i32, %c0_i32_0 : i32, i32
  }
  func.func @transform_4(%arg0: i32) -> (i32, i32) {
    %c0_i32 = arith.constant 0 : i32
    %c0_i32_0 = arith.constant 0 : i32
    %c0_i32_1 = arith.constant 0 : i32
    return %c0_i32, %c0_i32_0 : i32, i32
  }
  func.func @transform_5(%arg0: i32) -> (i32, i32) {
    %c0_i32 = arith.constant 0 : i32
    %c0_i32_0 = arith.constant 0 : i32
    return %arg0, %c0_i32 : i32, i32
  }
}

</mosaic_0001>

<bundles_post_ra>
// kernel: tpu_custom_call.1
= control target key start
LH: loop header
LB: loop body
LE: loop exit
PB: predicated region body
PF: predicated region fallthrough
CT: control target
= control target key end

     0   :  { %10 = vsyncpa [#allocation3], 0  ;;  %s542_s0 = inlined_call_operand.hbm [shape: f32[16,32], index: 0, kind: input, shape index: {}]   ;;  %s543_s1 = inlined_call_operand.hbm [shape: f32[32,32], index: 1, kind: input, shape index: {}]   ;;  %s544_s2 = inlined_call_operand.vmem [shape: f32[1,32], index: 2, kind: input, shape index: {}]   ;;  %s545_s3 = inlined_call_operand.hbm [shape: f32[32,128], index: 3, kind: input, shape index: {}]   ;;  %s546_s4 = inlined_call_operand.vmem [shape: f32[1,128], index: 4, kind: input, shape index: {}]   ;;  %s547_s5 = inlined_call_operand.hbm [shape: f32[16,128], index: 5, kind: output, shape index: {}]  }
   0x1   :  { %11 = vsyncpa [#allocation6], 0 }
   0x2   :  { %12 = vsyncpa [#allocation4], 0  ;;  %s429_s18 = smov [#allocation5]   ;;  %s430_s20 = smov [#allocation2]  }
   0x3   :  { %s30_s19 = sshll.u32 %s429_s18, 4  ;;  %s18_s21 = sshll.u32 %s430_s20, 4  ;;  %s31_s19 = int_to_ptr.vmem [resolvable:$true] %s30_s19  ;;  %s465_s21 = int_to_ptr.vmem [resolvable:$true] %s18_s21 }
   0x4   :  { %s335_s24 = scalar_lea.hbm %s543_s1, 512 }
   0x5   :  { %p336_p0 = scmp.ne.s32.totalorder %s543_s1, %s335_s24  ;;  %p339_p1 = scmp.lt.u32.totalorder %s335_s24, %s543_s1 }
   0x7   :  { %p341_p2 = pnand %p339_p1, %p336_p0 }
   0x9   :  { %344 = shalt.err (!%p341_p2)
}
   0xa   :  { %s345_s29 = scalar_lea.vmem %s31_s19, 512  ;;  %p350_p4 = scmp.lt.s32.totalorder %s31_s19, %s31_s19 }
   0xb   :  { %p346_p3 = scmp.ne.s32.totalorder %s31_s19, %s345_s29  ;;  %p351_p5 = scmp.lt.s32.totalorder %s345_s29, %s345_s29 }
   0xd   :  { %p352_p6 = por %p351_p5, %p350_p4 }
   0xf   :  { %p353_p7 = pnand %p352_p6, %p346_p3 }
  0x11   :  { %356 = shalt.err (!%p353_p7)
}
  0x12   :  { %s431_s30 = smov 128   ;;  %s432_s6 = smov 8  }
  0x13   :  { %36 = dma.hbm_to_vmem [thread:$0]  %s543_s1, 512, %s31_s19, [#allocation6], %s431_s30, %s431_s30, %s432_s6  }
  0x14   :  { %s357_s11 = scalar_lea.hbm %s542_s0, 256 }
  0x15   :  { %p358_p8 = scmp.ne.s32.totalorder %s542_s0, %s357_s11  ;;  %p361_p9 = scmp.lt.u32.totalorder %s357_s11, %s542_s0 }
  0x17   :  { %p363_p10 = pnand %p361_p9, %p358_p8 }
  0x19   :  { %366 = shalt.err (!%p363_p10)
}
  0x1a   :  { %s367_s16 = scalar_lea.vmem %s465_s21, 256  ;;  %p372_p12 = scmp.lt.s32.totalorder %s465_s21, %s465_s21 }
  0x1b   :  { %p368_p11 = scmp.ne.s32.totalorder %s465_s21, %s367_s16  ;;  %p373_p13 = scmp.lt.s32.totalorder %s367_s16, %s367_s16 }
  0x1d   :  { %p374_p0 = por %p373_p13, %p372_p12 }
  0x1f   :  { %p375_p1 = pnand %p374_p0, %p368_p11 }
  0x21   :  { %378 = shalt.err (!%p375_p1)
}
  0x22   :  { %24 = dma.hbm_to_vmem [thread:$0]  %s542_s0, 256, %s465_s21, [#allocation3], %s431_s30, %s431_s30, %s432_s6  }
  0x23   :  { %s433_s18 = smov [#allocation7]   ;;  %s379_s23 = scalar_lea.hbm %s545_s3, 512 }
  0x24   :  { %s44_s19 = sshll.u32 %s433_s18, 4  ;;  %p380_p2 = scmp.ne.s32.totalorder %s545_s3, %s379_s23  ;;  %s45_s19 = int_to_ptr.vmem [resolvable:$true] %s44_s19 }
  0x25   :  { %p383_p3 = scmp.lt.u32.totalorder %s379_s23, %s545_s3 }
  0x27   :  { %p385_p4 = pnand %p383_p3, %p380_p2 }
  0x29   :  { %388 = shalt.err (!%p385_p4)
}
  0x2a   :  { %s389_s28 = scalar_lea.vmem %s45_s19, 512  ;;  %p394_p6 = scmp.lt.s32.totalorder %s45_s19, %s45_s19 }
  0x2b   :  { %p390_p5 = scmp.ne.s32.totalorder %s45_s19, %s389_s28  ;;  %p395_p7 = scmp.lt.s32.totalorder %s389_s28, %s389_s28 }
  0x2d   :  { %p396_p8 = por %p395_p7, %p394_p6 }
  0x2f   :  { %p397_p9 = pnand %p396_p8, %p390_p5 }
  0x31   :  { %400 = shalt.err (!%p397_p9)
}
  0x32   :  { %50 = dma.hbm_to_vmem [thread:$0]  %s545_s3, 512, %s45_s19, [#allocation6], %s431_s30, %s431_s30, %s432_s6  }
  0x33   :  { %423 = dma.done.wait [#allocation3], 256  }
  0x34   :  { %424 = vsyncadd [#allocation3], 4294967040 }
  0x35   :  { %425 = dma.done.wait [#allocation6], 1024  }
  0x36   :  { %426 = vsyncadd [#allocation6], 4294966272  ;;  %vm75_vm0 = vcmask 261120   ;;  %v64_v0 = vld [vmem:[#allocation5] sm:$0xff]  ;;  %v65_v1 = vld [vmem:[#allocation5 + $0x8] sm:$0xff]  ;;  %s434_s9 = smov [#allocation8]  }
  0x37   :  { %v66_v2 = vld [vmem:[#allocation5 + $0x10] sm:$0xff]  ;;  %v313_v3 = vpack.c.bf16 %v65_v1, %v64_v0  ;;  %v67_v4 = vld [vmem:[#allocation5 + $0x18] sm:$0xff]  ;;  %v159_v7 = vld [vmem:[#allocation7] sm:$0xff]  ;;  %s260_s10 = sshll.u32 %s434_s9, 4  ;;  %s261_s10 = int_to_ptr.vmem [resolvable:$true] %s260_s10 }
  0x38   :  { %v62_v5 = vld [vmem:[#allocation2] sm:$0xff]  ;;  %v317_v6 = vpack.c.bf16 %v67_v4, %v66_v2  ;;  %v160_v8 = vld [vmem:[#allocation7 + $0x8] sm:$0xff]  ;;  %v63_v10 = vld [vmem:[#allocation2 + $0x8] sm:$0xff]  ;;  %p406_p11 = scmp.lt.s32.totalorder %s261_s10, %s261_s10 }
  0x39   :  { %299 = vmatprep.mubr.msk.f32.mxu0 %vm75_vm0, %v62_v5  ;;  %314 = vmatprep.subr.bf16.mxu0 %v313_v3  ;;  %v321_v9 = vpack.c.bf16 %v160_v8, %v159_v7  ;;  %v161_v11 = vld [vmem:[#allocation7 + $0x10] sm:$0xff]  ;;  %v162_v12 = vld [vmem:[#allocation7 + $0x18] sm:$0xff] }
  0x3a   :  { %316 = vmatpush3.bf16.msra.mxu0 %v313_v3  ;;  %v325_v13 = vpack.c.bf16 %v162_v12, %v161_v11  ;;  %v273_v14 = vld [vmem:[%s544_s2] ss:$0 sm:$0xff]  ;;  %s401_s2 = scalar_lea.vmem %s261_s10, 256 }
  0x3b   :  { %318 = vmatprep.subr.bf16.mxu0 %v317_v6  ;;  %322 = vmatprep.subr.bf16.mxu1 %v321_v9  ;;  %v276_v21 = vld [vmem:[%s546_s4] ss:$0 sm:$0xff]  ;;  %p402_p10 = scmp.ne.s32.totalorder %s261_s10, %s401_s2  ;;  %p407_p12 = scmp.lt.s32.totalorder %s401_s2, %s401_s2 }
  0x3c   :  { %324 = vmatpush3.bf16.msra.mxu1 %v321_v9 }
  0x3d   :  { %326 = vmatprep.subr.bf16.mxu1 %v325_v13  ;;  %p408_p13 = por %p407_p12, %p406_p11 }
  0x3e   :  { %320 = vmatpush3.bf16.msra.mxu0 %v317_v6 }
  0x3f   :  { %p409_p0 = pnand %p408_p13, %p402_p10 }
  0x40   :  { %328 = vmatpush3.bf16.msra.mxu1 %v325_v13 }
  0x41   :  { %300 = vmatmul.mubr.msk.f32.vlgmr.msra.gmra.mrb[0].mxu0 %vm75_vm0, %v63_v10 }
 0x114   :  { %v301_v15 = vpop.f32.mrb[0].mxu0 }
 0x115   :  { %v154_v16 = vadd.f32 %v301_v15, %v273_v14  ;;  %v148_v17 = vpop.f32.mrb[1].mxu0 }
 0x116   :  { %v149_v18 = vadd.f32 %v273_v14, %v148_v17 }
 0x117   :  { %v158_v20 = vmax.f32 %v154_v16, 0.0 }
 0x118   :  { %v157_v19 = vmax.f32 %v149_v18, 0.0 }
 0x11a   :  { %310 = vmatprep.mubr.msk.f32.mxu1 %vm75_vm0, %v157_v19 }
 0x11b   :  { %311 = vmatmul.mubr.msk.f32.vlgmr.msra.gmra.mrb[0].mxu1 %vm75_vm0, %v158_v20 }
 0x1ee   :  { %v312_v22 = vpop.f32.mrb[0].mxu1 }
 0x1ef   :  { %v248_v23 = vadd.f32 %v312_v22, %v276_v21  ;;  %v242_v24 = vpop.f32.mrb[1].mxu1 }
 0x1f0   :  { %v243_v25 = vadd.f32 %v276_v21, %v242_v24 }
 0x1f1   :  { %v252_v26 = vmax.f32 %v248_v23, 0.0 }
 0x1f2   :  { %v251_v27 = vmax.f32 %v243_v25, 0.0 }
 0x1f3   :  { %254 = vst [vmem:[#allocation8 + $0x8] sm:$0xff] %v252_v26 }
 0x1f4   :  { %253 = vst [vmem:[#allocation8] sm:$0xff] %v251_v27 }
 0x1f5   :  { %412 = shalt.err (!%p409_p0)
}
 0x1f6   :  { %s413_s12 = scalar_lea.hbm %s547_s5, 256 }
 0x1f7   :  { %p414_p1 = scmp.ne.s32.totalorder %s547_s5, %s413_s12  ;;  %p417_p2 = scmp.lt.u32.totalorder %s413_s12, %s547_s5 }
 0x1f9   :  { %p419_p3 = pnand %p417_p2, %p414_p1 }
 0x1fb   :  { %422 = shalt.err (!%p419_p3)
}
 0x1fc   :  { %266 = dma.vmem_to_hbm [thread:$0]  %s261_s10, 256, %s547_s5, [#allocation4], %s431_s30, %s431_s30, %s432_s6  }
 0x1fd   :  { %427 = dma.done.wait [#allocation4], 256  }
 0x1fe   :  { %428 = vsyncadd [#allocation4], 4294967040 }
 0x1ff   :  { %270 = vsyncpa [#allocation3], 1 }
 0x200   :  { %271 = vsyncpa [#allocation6], 1 }
 0x201   :  { %272 = vsyncpa [#allocation4], 1 }

</bundles_post_ra>
